<compile_context>
chip_gen: v7x
topology: tpu7x:2x2x1
jax: 0.10.0
libtpu: 0.0.40
codegen_flags: <defaults>
</compile_context>

<pallas_src>
import functools

import jax
import jax.numpy as jnp
from jax.experimental import pallas as pl
from jax.experimental.pallas import tpu as pltpu


def _round_up(v, m):
    return ((v + m - 1) // m) * m


# ----------------------------------------------------------------------------
# Kernel: fused 3-layer MLP on one batch tile. bf16 MXU operands, f32 accumulate,
# f32 biases, f32 output.
# ----------------------------------------------------------------------------
def mlp_kernel(x_ref, w1_ref, b1_ref, w2_ref, b2_ref, w3_ref, b3_ref, o_ref):
    # Layer 1: Linear(784 -> L) + ReLU
    x = x_ref[...].astype(jnp.bfloat16)
    h1 = jnp.dot(x, w1_ref[...], preferred_element_type=jnp.float32)
    h1 = jnp.maximum(h1 + b1_ref[...], 0.0)

    # Layer 2: Linear(L -> L) + ReLU
    h2 = jnp.dot(h1.astype(jnp.bfloat16), w2_ref[...],
                 preferred_element_type=jnp.float32)
    h2 = jnp.maximum(h2 + b2_ref[...], 0.0)

    # Output layer: Linear(L -> 128 padded), no activation
    out = jnp.dot(h2.astype(jnp.bfloat16), w3_ref[...],
                  preferred_element_type=jnp.float32)
    # TODO(synk): emit bf16 logits here (halves the writeback, a win on HBM-bound
    # v6e/v7x) if downstream accepts bf16 -- kept f32 to match the PyTorch module.
    o_ref[...] = (out + b3_ref[...]).astype(o_ref.dtype)


# ----------------------------------------------------------------------------
# One-time weight preparation (hoisted out of the per-call path).
# ----------------------------------------------------------------------------
def prepare_params(w1, b1, w2, b2, w3, b3):
    """Cast weights to bf16 for the MXU and pad the 10-wide output layer to a
    lane-dense 128 columns. Biases stay f32 (added after f32 accumulation).
    Call once; reuse the returned dict for every forward call.

    Note: the optional 784->896 K-padding of w1/x was skipped on purpose -- x is
    fed to the kernel unmodified (f32, 784 cols), so padding it would reintroduce
    a per-call wrapper pass over x.
    """
    layer_size = w1.shape[1]
    n_out = w3.shape[1]
    n_out_p = _round_up(n_out, 128)

    w3p = jnp.zeros((layer_size, n_out_p), jnp.float32).at[:, :n_out].set(w3)
    b3p = jnp.zeros((1, n_out_p), jnp.float32).at[:, :n_out].set(
        jnp.reshape(b3, (1, -1)))

    return {
        "w1": w1.astype(jnp.bfloat16),
        "b1": jnp.reshape(b1, (1, -1)).astype(jnp.float32),
        "w2": w2.astype(jnp.bfloat16),
        "b2": jnp.reshape(b2, (1, -1)).astype(jnp.float32),
        "w3": w3p.astype(jnp.bfloat16),
        "b3": b3p,
    }


# ----------------------------------------------------------------------------
# Batch tile selection.
# ----------------------------------------------------------------------------
_TM_MAX = 512  # amortizes the ~0.35us/grid-step overhead; working set at
               # layer_size=1024 is ~12 MiB, within v5e's 16 MiB default scoped VMEM.


def _choose_tm(batch):
    b = _round_up(batch, 16)              # 16-row alignment (bf16 sublane packing)
    if b <= 32:
        return b                          # tiny batch: one tile, splitting only adds overhead
    # >= 2 grid steps so v7x's two TensorCores both get work; cap tile at _TM_MAX.
    n_steps = max(2, pl.cdiv(b, _TM_MAX))
    return _round_up(pl.cdiv(b, n_steps), 16)


# ----------------------------------------------------------------------------
# Forward pass. `params` must come from prepare_params().
# ----------------------------------------------------------------------------
@functools.partial(jax.jit, static_argnames=("n_out",))
def simple_test_model(x, params, n_out=10):
    batch, in_features = x.shape
    w1, b1 = params["w1"], params["b1"]
    w2, b2 = params["w2"], params["b2"]
    w3, b3 = params["w3"], params["b3"]
    layer_size = w1.shape[1]
    n_out_p = w3.shape[1]

    tm = _choose_tm(batch)
    padded_batch = _round_up(batch, tm)
    if padded_batch != batch:
        x = jnp.pad(x, ((0, padded_batch - batch), (0, 0)))
    grid = (padded_batch // tm,)

    # Constant-index (resident) blocks: single-buffered -- a second buffer would
    # only double their VMEM footprint (binding once layer_size grows on v7x).
    def resident(shape):
        return pl.BlockSpec(shape, lambda i: (0,) * len(shape),
                            pipeline_mode=pl.Buffered(1))

    # Honest scheduler hint: last layer counted at n_out (10), not the padded 128.
    flops = 2 * padded_batch * (in_features * layer_size
                                + layer_size * layer_size
                                + layer_size * n_out)
    bytes_accessed = (
        x.size * x.dtype.itemsize
        + w1.size * 2 + w2.size * 2 + w3.size * 2
        + b1.size * 4 + b2.size * 4 + b3.size * 4
        + padded_batch * n_out_p * 4
    )

    out = pl.pallas_call(
        mlp_kernel,
        out_shape=jax.ShapeDtypeStruct((padded_batch, n_out_p), jnp.float32),
        grid=grid,
        in_specs=[
            pl.BlockSpec((tm, in_features), lambda i: (i, 0)),   # x: tiled over batch
            resident(w1.shape), resident(b1.shape),              # weights/biases resident
            resident(w2.shape), resident(b2.shape),
            resident(w3.shape), resident(b3.shape),
        ],
        out_specs=pl.BlockSpec((tm, n_out_p), lambda i: (i, 0)),
        compiler_params=pltpu.CompilerParams(
            dimension_semantics=("parallel",),
        ),
        cost_estimate=pl.CostEstimate(
            flops=flops, transcendentals=0, bytes_accessed=bytes_accessed),
    )(x, w1, b1, w2, b2, w3, b3)

    return out[:batch, :n_out]


# ----------------------------------------------------------------------------
# Test harness.
# ----------------------------------------------------------------------------
def init_linear(key, fan_in, fan_out):
    """Deterministic init mimicking nn.Linear: U(-1/sqrt(fan_in), 1/sqrt(fan_in))."""
    kw, kb = jax.random.split(key)
    bound = 1.0 / jnp.sqrt(jnp.float32(fan_in))
    w = jax.random.uniform(kw, (fan_in, fan_out), jnp.float32, -bound, bound)
    b = jax.random.uniform(kb, (1, fan_out), jnp.float32, -bound, bound)
    return w, b


def _check(x, params, w1, b1, w2, b2, w3, b3, n_classes):
    out = simple_test_model(x, params, n_out=n_classes)
    out = jax.block_until_ready(out)
    assert out.shape == (x.shape[0], n_classes)

    # Reference with the same mixed precision (bf16 matmul operands, f32 accumulate).
    def mm(a, b):
        return jnp.dot(a.astype(jnp.bfloat16), b.astype(jnp.bfloat16),
                       preferred_element_type=jnp.float32)

    h = jnp.maximum(mm(x, w1) + b1, 0.0)
    h = jnp.maximum(mm(h, w2) + b2, 0.0)
    ref = mm(h, w3) + b3
    assert jnp.allclose(out, ref, atol=1e-2, rtol=1e-2)

    # Sanity: still close to the full-f32 forward pass of the original module.
    hf = jnp.maximum(x @ w1 + b1, 0.0)
    hf = jnp.maximum(hf @ w2 + b2, 0.0)
    reff = hf @ w3 + b3
    assert jnp.allclose(out, reff, atol=5e-2, rtol=5e-2)


if __name__ == "__main__":
    # Module-consistent small shapes: input features fixed at 784 by the module;
    # small layer_size for the test. Two batch sizes exercise both the single-tile
    # and the multi-step (dual-TC-friendly) grid paths.
    in_features = 784
    layer_size = 256
    n_classes = 10

    key = jax.random.PRNGKey(0)
    kx1, kx2, k1, k2, k3 = jax.random.split(key, 5)

    w1, b1 = init_linear(k1, in_features, layer_size)
    w2, b2 = init_linear(k2, layer_size, layer_size)
    w3, b3 = init_linear(k3, layer_size, n_classes)

    # One-time weight prep (bf16 cast + lane padding) -- hoisted out of the call path.
    params = jax.tree_util.tree_map(jax.block_until_ready,
                                    prepare_params(w1, b1, w2, b2, w3, b3))

    x_small = jax.random.normal(kx1, (16, in_features), jnp.float32)   # single tile
    x_multi = jax.random.normal(kx2, (96, in_features), jnp.float32)   # 2 grid steps

    _check(x_small, params, w1, b1, w2, b2, w3, b3, n_classes)
    _check(x_multi, params, w1, b1, w2, b2, w3, b3, n_classes)

    print("KERNEL_OK")
</pallas_src>

<mosaic_0001>
module attributes {stable_mosaic.version = 11 : i64} {
  func.func @mlp_kernel(%arg0: i32, %arg1: memref<16x784xf32, #tpu.memory_space<vmem>>, %arg2: memref<784x256xbf16, #tpu.memory_space<vmem>>, %arg3: memref<1x256xf32, #tpu.memory_space<vmem>>, %arg4: memref<256x256xbf16, #tpu.memory_space<vmem>>, %arg5: memref<1x256xf32, #tpu.memory_space<vmem>>, %arg6: memref<256x128xbf16, #tpu.memory_space<vmem>>, %arg7: memref<1x128xf32, #tpu.memory_space<vmem>>, %arg8: memref<16x128xf32, #tpu.memory_space<vmem>>) attributes {dimension_semantics = [#tpu.dimension_semantics<parallel>], iteration_bounds = array<i64: 1>, scalar_prefetch = 0 : i64, scratch_operands = 0 : i64, tpu.core_type = #tpu.core_type<tc>, window_params = [{transform_indices = @transform_0, window_bounds = array<i64: 16, 784>}, {pipeline_mode = #tpu.pipeline_mode<synchronous>, transform_indices = @transform_1, window_bounds = array<i64: 784, 256>}, {pipeline_mode = #tpu.pipeline_mode<synchronous>, transform_indices = @transform_2, window_bounds = array<i64: 1, 256>}, {pipeline_mode = #tpu.pipeline_mode<synchronous>, transform_indices = @transform_3, window_bounds = array<i64: 256, 256>}, {pipeline_mode = #tpu.pipeline_mode<synchronous>, transform_indices = @transform_4, window_bounds = array<i64: 1, 256>}, {pipeline_mode = #tpu.pipeline_mode<synchronous>, transform_indices = @transform_5, window_bounds = array<i64: 256, 128>}, {pipeline_mode = #tpu.pipeline_mode<synchronous>, transform_indices = @transform_6, window_bounds = array<i64: 1, 128>}, {transform_indices = @transform_7, window_bounds = array<i64: 16, 128>}]} {
    %c0 = arith.constant 0 : index
    %c0_0 = arith.constant 0 : index
    %0 = vector.load %arg1[%c0, %c0_0] : memref<16x784xf32, #tpu.memory_space<vmem>>, vector<16x784xf32>
    %1 = arith.truncf %0 : vector<16x784xf32> to vector<16x784xbf16>
    %c0_1 = arith.constant 0 : index
    %c0_2 = arith.constant 0 : index
    %2 = vector.load %arg2[%c0_1, %c0_2] : memref<784x256xbf16, #tpu.memory_space<vmem>>, vector<784x256xbf16>
    %cst = arith.constant dense<0.000000e+00> : vector<16x256xf32>
    %3 = tpu.matmul %1, %2, %cst {dimension_numbers = #tpu.dot_dimension_numbers<[1], [0], [0], [1], [0, 0, 1, 1], [], []>} : vector<16x784xbf16>, vector<784x256xbf16>, vector<16x256xf32> -> vector<16x256xf32>
    %c0_3 = arith.constant 0 : index
    %c0_4 = arith.constant 0 : index
    %4 = vector.load %arg3[%c0_3, %c0_4] : memref<1x256xf32, #tpu.memory_space<vmem>>, vector<1x256xf32>
    %5 = vector.broadcast %4 : vector<1x256xf32> to vector<16x256xf32>
    %6 = arith.addf %3, %5 : vector<16x256xf32>
    %cst_5 = arith.constant 0.000000e+00 : f32
    %7 = vector.broadcast %cst_5 : f32 to vector<16x256xf32>
    %8 = arith.maximumf %6, %7 : vector<16x256xf32>
    %9 = arith.truncf %8 : vector<16x256xf32> to vector<16x256xbf16>
    %c0_6 = arith.constant 0 : index
    %c0_7 = arith.constant 0 : index
    %10 = vector.load %arg4[%c0_6, %c0_7] : memref<256x256xbf16, #tpu.memory_space<vmem>>, vector<256x256xbf16>
    %cst_8 = arith.constant dense<0.000000e+00> : vector<16x256xf32>
    %11 = tpu.matmul %9, %10, %cst_8 {dimension_numbers = #tpu.dot_dimension_numbers<[1], [0], [0], [1], [0, 0, 1, 1], [], []>} : vector<16x256xbf16>, vector<256x256xbf16>, vector<16x256xf32> -> vector<16x256xf32>
    %c0_9 = arith.constant 0 : index
    %c0_10 = arith.constant 0 : index
    %12 = vector.load %arg5[%c0_9, %c0_10] : memref<1x256xf32, #tpu.memory_space<vmem>>, vector<1x256xf32>
    %13 = vector.broadcast %12 : vector<1x256xf32> to vector<16x256xf32>
    %14 = arith.addf %11, %13 : vector<16x256xf32>
    %cst_11 = arith.constant 0.000000e+00 : f32
    %15 = vector.broadcast %cst_11 : f32 to vector<16x256xf32>
    %16 = arith.maximumf %14, %15 : vector<16x256xf32>
    %17 = arith.truncf %16 : vector<16x256xf32> to vector<16x256xbf16>
    %c0_12 = arith.constant 0 : index
    %c0_13 = arith.constant 0 : index
    %18 = vector.load %arg6[%c0_12, %c0_13] : memref<256x128xbf16, #tpu.memory_space<vmem>>, vector<256x128xbf16>
    %cst_14 = arith.constant dense<0.000000e+00> : vector<16x128xf32>
    %19 = tpu.matmul %17, %18, %cst_14 {dimension_numbers = #tpu.dot_dimension_numbers<[1], [0], [0], [1], [0, 0, 1, 1], [], []>} : vector<16x256xbf16>, vector<256x128xbf16>, vector<16x128xf32> -> vector<16x128xf32>
    %c0_15 = arith.constant 0 : index
    %c0_16 = arith.constant 0 : index
    %20 = vector.load %arg7[%c0_15, %c0_16] : memref<1x128xf32, #tpu.memory_space<vmem>>, vector<1x128xf32>
    %21 = vector.broadcast %20 : vector<1x128xf32> to vector<16x128xf32>
    %22 = arith.addf %19, %21 : vector<16x128xf32>
    %c0_17 = arith.constant 0 : index
    %c0_18 = arith.constant 0 : index
    %23 = vector.load %arg8[%c0_17, %c0_18] : memref<16x128xf32, #tpu.memory_space<vmem>>, vector<16x128xf32>
    tpu.vector_store %arg8[%c0_17, %c0_18], %22 {strides = array<i32>} : memref<16x128xf32, #tpu.memory_space<vmem>>, vector<16x128xf32>,
    return
  }
  func.func @transform_0(%arg0: i32) -> (i32, i32) {
    %c0_i32 = arith.constant 0 : i32
    %c0_i32_0 = arith.constant 0 : i32
    return %arg0, %c0_i32 : i32, i32
  }
  func.func @transform_1(%arg0: i32) -> (i32, i32) {
    %c0_i32 = arith.constant 0 : i32
    %c0_i32_0 = arith.constant 0 : i32
    %c0_i32_1 = arith.constant 0 : i32
    return %c0_i32, %c0_i32_0 : i32, i32
  }
  func.func @transform_2(%arg0: i32) -> (i32, i32) {
    %c0_i32 = arith.constant 0 : i32
    %c0_i32_0 = arith.constant 0 : i32
    %c0_i32_1 = arith.constant 0 : i32
    return %c0_i32, %c0_i32_0 : i32, i32
  }
  func.func @transform_3(%arg0: i32) -> (i32, i32) {
    %c0_i32 = arith.constant 0 : i32
    %c0_i32_0 = arith.constant 0 : i32
    %c0_i32_1 = arith.constant 0 : i32
    return %c0_i32, %c0_i32_0 : i32, i32
  }
  func.func @transform_4(%arg0: i32) -> (i32, i32) {
    %c0_i32 = arith.constant 0 : i32
    %c0_i32_0 = arith.constant 0 : i32
    %c0_i32_1 = arith.constant 0 : i32
    return %c0_i32, %c0_i32_0 : i32, i32
  }
  func.func @transform_5(%arg0: i32) -> (i32, i32) {
    %c0_i32 = arith.constant 0 : i32
    %c0_i32_0 = arith.constant 0 : i32
    %c0_i32_1 = arith.constant 0 : i32
    return %c0_i32, %c0_i32_0 : i32, i32
  }
  func.func @transform_6(%arg0: i32) -> (i32, i32) {
    %c0_i32 = arith.constant 0 : i32
    %c0_i32_0 = arith.constant 0 : i32
    %c0_i32_1 = arith.constant 0 : i32
    return %c0_i32, %c0_i32_0 : i32, i32
  }
  func.func @transform_7(%arg0: i32) -> (i32, i32) {
    %c0_i32 = arith.constant 0 : i32
    %c0_i32_0 = arith.constant 0 : i32
    return %arg0, %c0_i32 : i32, i32
  }
}

</mosaic_0001>

<bundles_post_ra>
// kernel: simple_test_model.1
= control target key start
LH: loop header
LB: loop body
LE: loop exit
PB: predicated region body
PF: predicated region fallthrough
CT: control target
= control target key end

     0   :  { %12 = vsyncpa [#allocation3], 0  ;;  %s2000_s0 = inlined_call_operand.hbm [shape: f32[16,784], index: 0, kind: input, shape index: {}]   ;;  %s2001_s1 = inlined_call_operand.hbm [shape: bf16[784,256], index: 1, kind: input, shape index: {}]   ;;  %s2002_s2 = inlined_call_operand.vmem [shape: f32[1,256], index: 2, kind: input, shape index: {}]   ;;  %s2003_s3 = inlined_call_operand.hbm [shape: bf16[256,256], index: 3, kind: input, shape index: {}]   ;;  %s2004_s4 = inlined_call_operand.vmem [shape: f32[1,256], index: 4, kind: input, shape index: {}]   ;;  %s2005_s5 = inlined_call_operand.hbm [shape: bf16[256,128], index: 5, kind: input, shape index: {}]   ;;  %s2006_s6 = inlined_call_operand.vmem [shape: f32[1,128], index: 6, kind: input, shape index: {}]   ;;  %s2007_s7 = inlined_call_operand.hbm [shape: f32[16,128], index: 7, kind: output, shape index: {}]  }
   0x1   :  { %13 = vsyncpa [#allocation6], 0 }
   0x2   :  { %14 = vsyncpa [#allocation9], 0 }
   0x3   :  { %15 = vsyncpa [#allocation4], 0  ;;  %s1863_s24 = smov [#allocation5]   ;;  %s1745_s28 = scalar_lea.hbm %s2001_s1, 12544 }
   0x4   :  { %s33_s25 = sshll.u32 %s1863_s24, 4  ;;  %p1746_p0 = scmp.ne.s32.totalorder %s2001_s1, %s1745_s28  ;;  %s34_s25 = int_to_ptr.vmem [resolvable:$true] %s33_s25 }
   0x5   :  { %p1749_p1 = scmp.lt.u32.totalorder %s1745_s28, %s2001_s1 }
   0x7   :  { %p1751_p2 = pnand %p1749_p1, %p1746_p0 }
   0x9   :  { %1754 = shalt.err (!%p1751_p2)
}
   0xa   :  { %s1755_s10 = scalar_lea.vmem %s34_s25, 12544  ;;  %p1760_p4 = scmp.lt.s32.totalorder %s34_s25, %s34_s25 }
   0xb   :  { %p1756_p3 = scmp.ne.s32.totalorder %s34_s25, %s1755_s10  ;;  %p1761_p5 = scmp.lt.s32.totalorder %s1755_s10, %s1755_s10 }
   0xd   :  { %p1762_p6 = por %p1761_p5, %p1760_p4 }
   0xf   :  { %p1763_p7 = pnand %p1762_p6, %p1756_p3 }
  0x11   :  { %1766 = shalt.err (!%p1763_p7)
}
  0x12   :  { %s1864_s11 = smov 128   ;;  %s1865_s12 = smov 8  }
  0x13   :  { %39 = dma.hbm_to_vmem [thread:$0]  %s2001_s1, 12544, %s34_s25, [#allocation6], %s1864_s11, %s1864_s11, %s1865_s12  }
  0x14   :  { %s1866_s15 = smov [#allocation2]   ;;  %s1767_s19 = scalar_lea.hbm %s2000_s0, 1792 }
  0x15   :  { %s21_s16 = sshll.u32 %s1866_s15, 4  ;;  %p1768_p8 = scmp.ne.s32.totalorder %s2000_s0, %s1767_s19  ;;  %s22_s16 = int_to_ptr.vmem [resolvable:$true] %s21_s16 }
  0x16   :  { %p1771_p9 = scmp.lt.u32.totalorder %s1767_s19, %s2000_s0 }
  0x18   :  { %p1773_p10 = pnand %p1771_p9, %p1768_p8 }
  0x1a   :  { %1776 = shalt.err (!%p1773_p10)
}
  0x1b   :  { %s1777_s24 = scalar_lea.vmem %s22_s16, 1792  ;;  %p1782_p12 = scmp.lt.s32.totalorder %s22_s16, %s22_s16 }
  0x1c   :  { %p1778_p11 = scmp.ne.s32.totalorder %s22_s16, %s1777_s24  ;;  %p1783_p13 = scmp.lt.s32.totalorder %s1777_s24, %s1777_s24 }
  0x1e   :  { %p1784_p0 = por %p1783_p13, %p1782_p12 }
  0x20   :  { %p1785_p1 = pnand %p1784_p0, %p1778_p11 }
  0x22   :  { %1788 = shalt.err (!%p1785_p1)
}
  0x23   :  { %s1867_s1 = smov 896   ;;  %s1868_s25 = smov 56  }
  0x24   :  { %27 = dma.hbm_to_vmem [thread:$0]  %s2000_s0, 1792, %s22_s16, [#allocation3], %s1867_s1, %s1867_s1, %s1868_s25  }
  0x25   :  { %s1869_s28 = smov [#allocation7]   ;;  %s1870_s30 = smov [#allocation8]  }
  0x26   :  { %s47_s29 = sshll.u32 %s1869_s28, 4  ;;  %s61_s8 = sshll.u32 %s1870_s30, 4  ;;  %s48_s29 = int_to_ptr.vmem [resolvable:$true] %s47_s29  ;;  %s1942_s8 = int_to_ptr.vmem [resolvable:$true] %s61_s8 }
  0x27   :  { %s1789_s13 = scalar_lea.hbm %s2003_s3, 4096 }
  0x28   :  { %p1790_p2 = scmp.ne.s32.totalorder %s2003_s3, %s1789_s13  ;;  %p1793_p3 = scmp.lt.u32.totalorder %s1789_s13, %s2003_s3 }
  0x2a   :  { %p1795_p4 = pnand %p1793_p3, %p1790_p2 }
  0x2c   :  { %1798 = shalt.err (!%p1795_p4)
}
  0x2d   :  { %s1799_s0 = scalar_lea.vmem %s48_s29, 4096  ;;  %p1804_p6 = scmp.lt.s32.totalorder %s48_s29, %s48_s29 }
  0x2e   :  { %p1800_p5 = scmp.ne.s32.totalorder %s48_s29, %s1799_s0  ;;  %p1805_p7 = scmp.lt.s32.totalorder %s1799_s0, %s1799_s0 }
  0x30   :  { %p1806_p8 = por %p1805_p7, %p1804_p6 }
  0x32   :  { %p1807_p9 = pnand %p1806_p8, %p1800_p5 }
  0x34   :  { %1810 = shalt.err (!%p1807_p9)
}
  0x35   :  { %53 = dma.hbm_to_vmem [thread:$0]  %s2003_s3, 4096, %s48_s29, [#allocation6], %s1864_s11, %s1864_s11, %s1865_s12  }
  0x36   :  { %s1811_s22 = scalar_lea.hbm %s2005_s5, 2048 }
  0x37   :  { %p1812_p10 = scmp.ne.s32.totalorder %s2005_s5, %s1811_s22  ;;  %p1815_p11 = scmp.lt.u32.totalorder %s1811_s22, %s2005_s5 }
  0x39   :  { %p1817_p12 = pnand %p1815_p11, %p1812_p10 }
  0x3b   :  { %1820 = shalt.err (!%p1817_p12)
}
  0x3c   :  { %s1821_s26 = scalar_lea.vmem %s1942_s8, 2048  ;;  %p1826_p0 = scmp.lt.s32.totalorder %s1942_s8, %s1942_s8 }
  0x3d   :  { %p1822_p13 = scmp.ne.s32.totalorder %s1942_s8, %s1821_s26  ;;  %p1827_p1 = scmp.lt.s32.totalorder %s1821_s26, %s1821_s26 }
  0x3f   :  { %p1828_p2 = por %p1827_p1, %p1826_p0 }
  0x41   :  { %p1829_p3 = pnand %p1828_p2, %p1822_p13 }
  0x43   :  { %1832 = shalt.err (!%p1829_p3)
}
  0x44   :  { %s1871_s3 = smov 64   ;;  %s1872_s27 = smov 4  }
  0x45   :  { %67 = dma.hbm_to_vmem [thread:$0]  %s2005_s5, 2048, %s1942_s8, [#allocation9], %s1871_s3, %s1871_s3, %s1872_s27  }
  0x46   :  { %1855 = dma.done.wait [#allocation3], 1792  }
  0x47   :  { %1856 = vsyncadd [#allocation3], 4294965504 }
  0x48   :  { %1857 = dma.done.wait [#allocation6], 16640  }
  0x49   :  { %1858 = vsyncadd [#allocation6], 4294950656 }
  0x4a   :  { %1859 = dma.done.wait [#allocation9], 2048  }
  0x4b   :  { %1860 = vsyncadd [#allocation9], 4294965248  ;;  %v1534_v0 = vld [vmem:[#allocation5 + $0x104] ss:$8 sps:$4 sm:$0xff]   ;;  %v1536_v1 = vld [vmem:[#allocation5 + $0x100] ss:$8 sps:$4 sm:$0xff]  }
  0x4c   :  { %751 = vmatprep.subr.bf16.mxu0 %v1534_v0  ;;  %v1537_v2 = vld [vmem:[#allocation5 + $0x114] ss:$8 sps:$4 sm:$0xff]   ;;  %v1539_v3 = vld [vmem:[#allocation5 + $0x110] ss:$8 sps:$4 sm:$0xff]   ;;  %v1540_v4 = vld [vmem:[#allocation5 + $0x124] ss:$8 sps:$4 sm:$0xff]  }
  0x4d   :  { %752 = vmatpush1.bf16.msra.mxu0 %v1536_v1  ;;  %v1542_v5 = vld [vmem:[#allocation5 + $0x120] ss:$8 sps:$4 sm:$0xff]   ;;  %v1543_v6 = vld [vmem:[#allocation5 + $0x134] ss:$8 sps:$4 sm:$0xff]   ;;  %v1545_v7 = vld [vmem:[#allocation5 + $0x130] ss:$8 sps:$4 sm:$0xff]  }
  0x4e   :  { %753 = vmatprep.subr.bf16.mxu0 %v1537_v2  ;;  %v1546_v8 = vld [vmem:[#allocation5 + $0x144] ss:$8 sps:$4 sm:$0xff]   ;;  %v1548_v9 = vld [vmem:[#allocation5 + $0x140] ss:$8 sps:$4 sm:$0xff]   ;;  %v1549_v10 = vld [vmem:[#allocation5 + $0x154] ss:$8 sps:$4 sm:$0xff]  }
  0x4f   :  { %v1551_v11 = vld [vmem:[#allocation5 + $0x150] ss:$8 sps:$4 sm:$0xff]   ;;  %v1552_v12 = vld [vmem:[#allocation5 + $0x164] ss:$8 sps:$4 sm:$0xff]   ;;  %v1554_v16 = vld [vmem:[#allocation5 + $0x160] ss:$8 sps:$4 sm:$0xff]  }
  0x50   :  { %v86_v13 = vld [vmem:[#allocation2 + $0x18] sm:$0xff]  ;;  %v93_v14 = vld [vmem:[#allocation2 + $0x50] sm:$0xff]  ;;  %v1555_v17 = vld [vmem:[#allocation5 + $0x174] ss:$8 sps:$4 sm:$0xff]   ;;  %vm704_vm0 = vcmask 130048   ;;  %s1874_s10 = smov [#allocation10]  }
  0x51   :  { %754 = vmatpush1.bf16.msra.mxu0 %v1539_v3  ;;  %v100_v15 = vpack.c.bf16 %v93_v14, %v86_v13  ;;  %v1588_v18 = vld [vmem:[#allocation5 + $0x4] ss:$8 sps:$4 sm:$0xff]   ;;  %v1557_v19 = vld [vmem:[#allocation5 + $0x170] ss:$8 sps:$4 sm:$0xff]   ;;  %v1593_v21 = vld [vmem:[#allocation5] ss:$8 sps:$4 sm:$0xff]  }
  0x52   :  { %755 = vmatprep.subr.bf16.mxu0 %v1540_v4  ;;  %v1558_v20 = vld [vmem:[#allocation5 + $0x184] ss:$8 sps:$4 sm:$0xff]   ;;  %708 = vmatprep.subr.bf16.mxu1 %v1588_v18  ;;  %v1594_v22 = vld [vmem:[#allocation5 + $0x14] ss:$8 sps:$4 sm:$0xff]   ;;  %v1560_v23 = vld [vmem:[#allocation5 + $0x180] ss:$8 sps:$4 sm:$0xff]  }
  0x53   :  { %783 = vmatprep.mubr.bf16.mxu0 %v100_v15  ;;  %709 = vmatpush1.bf16.msra.mxu1 %v1593_v21  ;;  %v1599_v24 = vld [vmem:[#allocation5 + $0x10] ss:$8 sps:$4 sm:$0xff]   ;;  %v1600_v25 = vld [vmem:[#allocation5 + $0x24] ss:$8 sps:$4 sm:$0xff]   ;;  %v1561_v26 = vld [vmem:[#allocation5 + $0x194] ss:$8 sps:$4 sm:$0xff]  }
  0x54   :  { %710 = vmatprep.subr.bf16.mxu1 %v1594_v22  ;;  %v1605_v27 = vld [vmem:[#allocation5 + $0x20] ss:$8 sps:$4 sm:$0xff]   ;;  %v1606_v28 = vld [vmem:[#allocation5 + $0x34] ss:$8 sps:$4 sm:$0xff]   ;;  %v1563_v29 = vld [vmem:[#allocation5 + $0x190] ss:$8 sps:$4 sm:$0xff]  }
  0x55   :  { %756 = vmatpush1.bf16.msra.mxu0 %v1542_v5  ;;  %v1564_v30 = vld [vmem:[#allocation5 + $0x1a4] ss:$8 sps:$4 sm:$0xff]   ;;  %v1611_v31 = vld [vmem:[#allocation5 + $0x30] ss:$8 sps:$4 sm:$0xff]   ;;  %v1566_v33 = vld [vmem:[#allocation5 + $0x1a0] ss:$8 sps:$4 sm:$0xff]  }
  0x56   :  { %757 = vmatprep.subr.bf16.mxu0 %v1543_v6  ;;  %v1612_v32 = vld [vmem:[#allocation5 + $0x44] ss:$8 sps:$4 sm:$0xff]   ;;  %v1567_v34 = vld [vmem:[#allocation5 + $0x1b4] ss:$8 sps:$4 sm:$0xff]   ;;  %v1617_v35 = vld [vmem:[#allocation5 + $0x40] ss:$8 sps:$4 sm:$0xff]  }
  0x57   :  { %711 = vmatpush1.bf16.msra.mxu1 %v1599_v24  ;;  %v1618_v36 = vld [vmem:[#allocation5 + $0x54] ss:$8 sps:$4 sm:$0xff]   ;;  %v1569_v37 = vld [vmem:[#allocation5 + $0x1b0] ss:$8 sps:$4 sm:$0xff]   ;;  %v1570_v38 = vld [vmem:[#allocation5 + $0x1c4] ss:$8 sps:$4 sm:$0xff]  }
  0x58   :  { %712 = vmatprep.subr.bf16.mxu1 %v1600_v25  ;;  %v1623_v39 = vld [vmem:[#allocation5 + $0x50] ss:$8 sps:$4 sm:$0xff]   ;;  %v1624_v40 = vld [vmem:[#allocation5 + $0x64] ss:$8 sps:$4 sm:$0xff]   ;;  %v1572_v41 = vld [vmem:[#allocation5 + $0x1c0] ss:$8 sps:$4 sm:$0xff]  }
  0x59   :  { %758 = vmatpush1.bf16.msra.mxu0 %v1545_v7  ;;  %v1573_v42 = vld [vmem:[#allocation5 + $0x1d4] ss:$8 sps:$4 sm:$0xff]   ;;  %v1629_v43 = vld [vmem:[#allocation5 + $0x60] ss:$8 sps:$4 sm:$0xff]   ;;  %v1575_v45 = vld [vmem:[#allocation5 + $0x1d0] ss:$8 sps:$4 sm:$0xff]  }
  0x5a   :  { %759 = vmatprep.subr.bf16.mxu0 %v1546_v8  ;;  %v1630_v44 = vld [vmem:[#allocation5 + $0x74] ss:$8 sps:$4 sm:$0xff]   ;;  %v1576_v46 = vld [vmem:[#allocation5 + $0x1e4] ss:$8 sps:$4 sm:$0xff]   ;;  %v1635_v47 = vld [vmem:[#allocation5 + $0x70] ss:$8 sps:$4 sm:$0xff]  }
  0x5b   :  { %713 = vmatpush1.bf16.msra.mxu1 %v1605_v27  ;;  %v1636_v48 = vld [vmem:[#allocation5 + $0x84] ss:$8 sps:$4 sm:$0xff]   ;;  %v1578_v49 = vld [vmem:[#allocation5 + $0x1e0] ss:$8 sps:$4 sm:$0xff]   ;;  %v1579_v50 = vld [vmem:[#allocation5 + $0x1f4] ss:$8 sps:$4 sm:$0xff]  }
  0x5c   :  { %714 = vmatprep.subr.bf16.mxu1 %v1606_v28  ;;  %v1641_v51 = vld [vmem:[#allocation5 + $0x80] ss:$8 sps:$4 sm:$0xff]   ;;  %v1642_v52 = vld [vmem:[#allocation5 + $0x94] ss:$8 sps:$4 sm:$0xff]   ;;  %v1581_v53 = vld [vmem:[#allocation5 + $0x1f0] ss:$8 sps:$4 sm:$0xff]  }
  0x5d   :  { %760 = vmatpush1.bf16.msra.mxu0 %v1548_v9  ;;  %v85_v54 = vld [vmem:[#allocation2 + $0x10] sm:$0xff]  ;;  %v92_v55 = vld [vmem:[#allocation2 + $0x48] sm:$0xff]  ;;  %v95_v62 = vld [vmem:[#allocation2 + $0x60] sm:$0xff]  ;;  %s1322_s13 = sshll.u32 %s1874_s10, 4  ;;  %s1323_s13 = int_to_ptr.vmem [resolvable:$true] %s1322_s13 }
  0x5e   :  { %761 = vmatprep.subr.bf16.mxu0 %v1549_v10  ;;  %v1584_v56 = vld [vmem:[#allocation5 + $0x204] ss:$8 sps:$4 sm:$0xff]   ;;  %v1647_v57 = vld [vmem:[#allocation5 + $0x90] ss:$8 sps:$4 sm:$0xff]   ;;  %v1582_v58 = vld [vmem:[#allocation5 + $0x200] ss:$8 sps:$4 sm:$0xff]   ;;  %v99_v59 = vpack.c.bf16 %v92_v55, %v85_v54  ;;  %p1838_p5 = scmp.lt.s32.totalorder %s1323_s13, %s1323_s13 }
  0x5f   :  { %715 = vmatpush1.bf16.msra.mxu1 %v1611_v31  ;;  %v1648_v60 = vld [vmem:[#allocation5 + $0xa4] ss:$8 sps:$4 sm:$0xff]   ;;  %v88_v61 = vld [vmem:[#allocation2 + $0x28] sm:$0xff]  ;;  %v1653_v1 = vld [vmem:[#allocation5 + $0xa0] ss:$8 sps:$4 sm:$0xff]   ;;  %s1833_s14 = scalar_lea.vmem %s1323_s13, 256 }
  0x60   :  { %716 = vmatprep.subr.bf16.mxu1 %v1612_v32  ;;  %v1587_v63 = vld [vmem:[#allocation5 + $0x214] ss:$8 sps:$4 sm:$0xff]   ;;  %v102_v0 = vpack.c.bf16 %v95_v62, %v88_v61  ;;  %v1585_v3 = vld [vmem:[#allocation5 + $0x210] ss:$8 sps:$4 sm:$0xff]   ;;  %v1592_v4 = vld [vmem:[#allocation5 + $0x224] ss:$8 sps:$4 sm:$0xff]   ;;  %p1834_p4 = scmp.ne.s32.totalorder %s1323_s13, %s1833_s14  ;;  %p1839_p6 = scmp.lt.s32.totalorder %s1833_s14, %s1833_s14 }
  0x61   :  { %762 = vmatpush1.bf16.msra.mxu0 %v1551_v11  ;;  %v1654_v2 = vld [vmem:[#allocation5 + $0xb4] ss:$8 sps:$4 sm:$0xff]   ;;  %v1659_v7 = vld [vmem:[#allocation5 + $0xb0] ss:$8 sps:$4 sm:$0xff]   ;;  %v1660_v9 = vld [vmem:[#allocation5 + $0xc4] ss:$8 sps:$4 sm:$0xff]  }
  0x62   :  { %763 = vmatprep.subr.bf16.mxu0 %v1552_v12  ;;  %v84_v5 = vld [vmem:[#allocation2 + $0x8] sm:$0xff]  ;;  %v91_v6 = vld [vmem:[#allocation2 + $0x40] sm:$0xff]  ;;  %v1590_v10 = vld [vmem:[#allocation5 + $0x220] ss:$8 sps:$4 sm:$0xff]   ;;  %p1840_p7 = por %p1839_p6, %p1838_p5 }
  0x63   :  { %717 = vmatpush1.bf16.msra.mxu1 %v1617_v35  ;;  %v98_v8 = vpack.c.bf16 %v91_v6, %v84_v5  ;;  %v1598_v11 = vld [vmem:[#allocation5 + $0x234] ss:$8 sps:$4 sm:$0xff]   ;;  %v1665_v12 = vld [vmem:[#allocation5 + $0xc0] ss:$8 sps:$4 sm:$0xff]   ;;  %v1596_v14 = vld [vmem:[#allocation5 + $0x230] ss:$8 sps:$4 sm:$0xff]  }
  0x64   :  { %718 = vmatprep.subr.bf16.mxu1 %v1618_v36  ;;  %v1666_v13 = vld [vmem:[#allocation5 + $0xd4] ss:$8 sps:$4 sm:$0xff]   ;;  %v1604_v15 = vld [vmem:[#allocation5 + $0x244] ss:$8 sps:$4 sm:$0xff]   ;;  %v1602_v18 = vld [vmem:[#allocation5 + $0x240] ss:$8 sps:$4 sm:$0xff]   ;;  %p1841_p8 = pnand %p1840_p7, %p1834_p4 }
  0x65   :  { %764 = vmatpush1.bf16.msra.mxu0 %v1554_v16  ;;  %740 = vmatprep.mubr.bf16.mxu1 %v98_v8  ;;  %v1671_v16 = vld [vmem:[#allocation5 + $0xd0] ss:$8 sps:$4 sm:$0xff]   ;;  %v1678_v21 = vld [vmem:[#allocation5 + $0xf4] ss:$8 sps:$4 sm:$0xff]   ;;  %v1614_v25 = vld [vmem:[#allocation5 + $0x260] ss:$8 sps:$4 sm:$0xff]  }
  0x66   :  { %765 = vmatprep.subr.bf16.mxu0 %v1555_v17  ;;  %v1672_v17 = vld [vmem:[#allocation5 + $0xe4] ss:$8 sps:$4 sm:$0xff]   ;;  %v1608_v22 = vld [vmem:[#allocation5 + $0x250] ss:$8 sps:$4 sm:$0xff]   ;;  %v1683_v28 = vld [vmem:[#allocation7 + $0x4] ss:$8 sps:$4 sm:$0xff]  }
  0x67   :  { %719 = vmatpush1.bf16.msra.mxu1 %v1623_v39  ;;  %v1680_v24 = vld [vmem:[#allocation5 + $0xf0] ss:$8 sps:$4 sm:$0xff]   ;;  %v90_v27 = vld [vmem:[#allocation2 + $0x38] sm:$0xff]  ;;  %v1689_v36 = vld [vmem:[#allocation7 + $0x24] ss:$8 sps:$4 sm:$0xff]  }
  0x68   :  { %720 = vmatprep.subr.bf16.mxu1 %v1624_v40  ;;  %v1686_v32 = vld [vmem:[#allocation7 + $0x14] ss:$8 sps:$4 sm:$0xff]   ;;  %v1684_v35 = vld [vmem:[#allocation7 + $0x10] ss:$8 sps:$4 sm:$0xff]   ;;  %v1687_v39 = vld [vmem:[#allocation7 + $0x20] ss:$8 sps:$4 sm:$0xff]  }
  0x69   :  { %766 = vmatpush1.bf16.msra.mxu0 %v1557_v19  ;;  %v1610_v19 = vld [vmem:[#allocation5 + $0x254] ss:$8 sps:$4 sm:$0xff]   ;;  %v1692_v40 = vld [vmem:[#allocation7 + $0x34] ss:$8 sps:$4 sm:$0xff]   ;;  %v1699_v55 = vld [vmem:[#allocation7 + $0x60] ss:$8 sps:$4 sm:$0xff]  }
  0x6a   :  { %767 = vmatprep.subr.bf16.mxu0 %v1558_v20  ;;  %v1677_v20 = vld [vmem:[#allocation5 + $0xe0] ss:$8 sps:$4 sm:$0xff]   ;;  %v1658_v54 = vld [vmem:[#allocation5 + $0x2d4] ss:$8 sps:$4 sm:$0xff]  }
  0x6b   :  { %721 = vmatpush1.bf16.msra.mxu1 %v1629_v43  ;;  %v1690_v43 = vld [vmem:[#allocation7 + $0x30] ss:$8 sps:$4 sm:$0xff]   ;;  %v1670_v62 = vld [vmem:[#allocation5 + $0x2f4] ss:$8 sps:$4 sm:$0xff]  }
  0x6c   :  { %722 = vmatprep.subr.bf16.mxu1 %v1630_v44  ;;  %v1695_v44 = vld [vmem:[#allocation7 + $0x44] ss:$8 sps:$4 sm:$0xff]   ;;  %v1662_v61 = vld [vmem:[#allocation5 + $0x2e0] ss:$8 sps:$4 sm:$0xff]  }
  0x6d   :  { %768 = vmatpush1.bf16.msra.mxu0 %v1560_v23  ;;  %v1616_v23 = vld [vmem:[#allocation5 + $0x264] ss:$8 sps:$4 sm:$0xff]   ;;  %v1708_v5 = vld [vmem:[#allocation7 + $0x90] ss:$8 sps:$4 sm:$0xff]  }
  0x6e   :  { %769 = vmatprep.subr.bf16.mxu0 %v1561_v26  ;;  %v83_v26 = vld [vmem:[#allocation2] sm:$0xff]  ;;  %v1674_v8 = vld [vmem:[#allocation5 + $0x300] ss:$8 sps:$4 sm:$0xff]  }
  0x6f   :  { %723 = vmatpush1.bf16.msra.mxu1 %v1635_v47  ;;  %v97_v31 = vpack.c.bf16 %v90_v27, %v83_v26  ;;  %v1693_v47 = vld [vmem:[#allocation7 + $0x40] ss:$8 sps:$4 sm:$0xff]  }
  0x70   :  { %724 = vmatprep.subr.bf16.mxu1 %v1636_v48  ;;  %v1698_v48 = vld [vmem:[#allocation7 + $0x54] ss:$8 sps:$4 sm:$0xff]  }
  0x71   :  { %770 = vmatpush1.bf16.msra.mxu0 %v1563_v29  ;;  %v1622_v29 = vld [vmem:[#allocation5 + $0x274] ss:$8 sps:$4 sm:$0xff]  }
  0x72   :  { %771 = vmatprep.subr.bf16.mxu0 %v1564_v30  ;;  %v1681_v30 = vld [vmem:[#allocation7] ss:$8 sps:$4 sm:$0xff]  }
  0x73   :  { %725 = vmatpush1.bf16.msra.mxu1 %v1641_v51  ;;  %v1696_v51 = vld [vmem:[#allocation7 + $0x50] ss:$8 sps:$4 sm:$0xff]  }
  0x74   :  { %726 = vmatprep.subr.bf16.mxu1 %v1642_v52  ;;  %v1701_v52 = vld [vmem:[#allocation7 + $0x64] ss:$8 sps:$4 sm:$0xff]  }
  0x75   :  { %772 = vmatpush1.bf16.msra.mxu0 %v1566_v33  ;;  %v1620_v33 = vld [vmem:[#allocation5 + $0x270] ss:$8 sps:$4 sm:$0xff]  }
  0x76   :  { %773 = vmatprep.subr.bf16.mxu0 %v1567_v34  ;;  %v1628_v34 = vld [vmem:[#allocation5 + $0x284] ss:$8 sps:$4 sm:$0xff]  }
  0x77   :  { %727 = vmatpush1.bf16.msra.mxu1 %v1647_v57  ;;  %v1656_v57 = vld [vmem:[#allocation5 + $0x2d0] ss:$8 sps:$4 sm:$0xff]  }
  0x78   :  { %728 = vmatprep.subr.bf16.mxu1 %v1648_v60  ;;  %v1707_v60 = vld [vmem:[#allocation7 + $0x84] ss:$8 sps:$4 sm:$0xff]  }
  0x79   :  { %774 = vmatpush1.bf16.msra.mxu0 %v1569_v37  ;;  %v1626_v37 = vld [vmem:[#allocation5 + $0x280] ss:$8 sps:$4 sm:$0xff]  }
  0x7a   :  { %775 = vmatprep.subr.bf16.mxu0 %v1570_v38  ;;  %v1634_v38 = vld [vmem:[#allocation5 + $0x294] ss:$8 sps:$4 sm:$0xff]  }
  0x7b   :  { %729 = vmatpush1.bf16.msra.mxu1 %v1653_v1  ;;  %v1668_v1 = vld [vmem:[#allocation5 + $0x2f0] ss:$8 sps:$4 sm:$0xff]  }
  0x7c   :  { %730 = vmatprep.subr.bf16.mxu1 %v1654_v2  ;;  %v87_v2 = vld [vmem:[#allocation2 + $0x20] sm:$0xff] }
  0x7d   :  { %776 = vmatpush1.bf16.msra.mxu0 %v1572_v41  ;;  %v1632_v41 = vld [vmem:[#allocation5 + $0x290] ss:$8 sps:$4 sm:$0xff]  }
  0x7e   :  { %777 = vmatprep.subr.bf16.mxu0 %v1573_v42  ;;  %v1640_v42 = vld [vmem:[#allocation5 + $0x2a4] ss:$8 sps:$4 sm:$0xff]  }
  0x7f   :  { %731 = vmatpush1.bf16.msra.mxu1 %v1659_v7  ;;  %v1713_v7 = vld [vmem:[#allocation7 + $0xa4] ss:$8 sps:$4 sm:$0xff]  }
  0x80   :  { %732 = vmatprep.subr.bf16.mxu1 %v1660_v9  ;;  %v1711_v9 = vld [vmem:[#allocation7 + $0xa0] ss:$8 sps:$4 sm:$0xff]  }
  0x81   :  { %778 = vmatpush1.bf16.msra.mxu0 %v1575_v45  ;;  %v1638_v45 = vld [vmem:[#allocation5 + $0x2a0] ss:$8 sps:$4 sm:$0xff]  }
  0x82   :  { %779 = vmatprep.subr.bf16.mxu0 %v1576_v46  ;;  %v1646_v46 = vld [vmem:[#allocation5 + $0x2b4] ss:$8 sps:$4 sm:$0xff]  }
  0x83   :  { %733 = vmatpush1.bf16.msra.mxu1 %v1665_v12  ;;  %v1714_v12 = vld [vmem:[#allocation7 + $0xb0] ss:$8 sps:$4 sm:$0xff]  }
  0x84   :  { %734 = vmatprep.subr.bf16.mxu1 %v1666_v13  ;;  %v1719_v13 = vld [vmem:[#allocation7 + $0xc4] ss:$8 sps:$4 sm:$0xff]  }
  0x85   :  { %780 = vmatpush1.bf16.msra.mxu0 %v1578_v49  ;;  %v1644_v49 = vld [vmem:[#allocation5 + $0x2b0] ss:$8 sps:$4 sm:$0xff]  }
  0x86   :  { %781 = vmatprep.subr.bf16.mxu0 %v1579_v50  ;;  %v1652_v50 = vld [vmem:[#allocation5 + $0x2c4] ss:$8 sps:$4 sm:$0xff]  }
  0x87   :  { %735 = vmatpush1.bf16.msra.mxu1 %v1671_v16  ;;  %v1717_v16 = vld [vmem:[#allocation7 + $0xc0] ss:$8 sps:$4 sm:$0xff]  }
  0x88   :  { %736 = vmatprep.subr.bf16.mxu1 %v1672_v17 }
  0x89   :  { %782 = vmatpush1.bf16.msra.mxu0 %v1581_v53  ;;  %v1650_v53 = vld [vmem:[#allocation5 + $0x2c0] ss:$8 sps:$4 sm:$0xff]  }
  0x8a   :  { %794 = vmatprep.subr.bf16.mxu0 %v1584_v56  ;;  %v1704_v56 = vld [vmem:[#allocation7 + $0x74] ss:$8 sps:$4 sm:$0xff]  }
  0x8b   :  { %737 = vmatpush1.bf16.msra.mxu1 %v1677_v20  ;;  %v1725_v20 = vld [vmem:[#allocation7 + $0xe4] ss:$8 sps:$4 sm:$0xff]  }
  0x8c   :  { %784 = vmatmul.mubr.bf16.vlgmr.msra.gmra.mrb[0].mxu0 %v99_v59  ;;  %738 = vmatprep.subr.bf16.mxu1 %v1678_v21  ;;  %v1702_v59 = vld [vmem:[#allocation7 + $0x70] ss:$8 sps:$4 sm:$0xff]   ;;  %v1723_v21 = vld [vmem:[#allocation7 + $0xe0] ss:$8 sps:$4 sm:$0xff]  }
  0x8d   :  { %795 = vmatpush1.bf16.msra.mxu0 %v1582_v58  ;;  %826 = vmatprep.mubr.bf16.mxu0 %v102_v0  ;;  %v1664_v58 = vld [vmem:[#allocation5 + $0x2e4] ss:$8 sps:$4 sm:$0xff]  }
  0x8e   :  { %796 = vmatprep.subr.bf16.mxu0 %v1587_v63  ;;  %v1705_v63 = vld [vmem:[#allocation7 + $0x80] ss:$8 sps:$4 sm:$0xff]   ;;  %v1710_v0 = vld [vmem:[#allocation7 + $0x94] ss:$8 sps:$4 sm:$0xff]  }
  0x8f   :  { %739 = vmatpush1.bf16.msra.mxu1 %v1680_v24  ;;  %v1729_v24 = vld [vmem:[#allocation8 + $0x40] sm:$0xff]  }
  0x90   :  { %1090 = vmatprep.subr.bf16.mxu1 %v1683_v28 }
  0x91   :  { %797 = vmatpush1.bf16.msra.mxu0 %v1585_v3  ;;  %v94_v3 = vld [vmem:[#allocation2 + $0x58] sm:$0xff] }
  0x92   :  { %798 = vmatprep.subr.bf16.mxu0 %v1592_v4  ;;  %741 = vmatmul.mubr.bf16.vlgmr.msra.gmra.mrb[0].mxu1 %v97_v31  ;;  %v1676_v4 = vld [vmem:[#allocation5 + $0x304] ss:$8 sps:$4 sm:$0xff]   ;;  %v101_v6 = vpack.c.bf16 %v94_v3, %v87_v2 }
  0x93   :  { %1091 = vmatpush1.bf16.msra.mxu1 %v1681_v30  ;;  %v1742_v2 = vld [vmem:[#allocation8 + $0x30] sm:$0xff]   ;;  %v1743_v3 = vld [vmem:[#allocation8 + $0x78] sm:$0xff]  }
  0x94   :  { %1092 = vmatprep.subr.bf16.mxu1 %v1686_v32  ;;  %v202_v32 = vld [vmem:[%s2002_s2] sm:$0x3] }
  0x95   :  { %799 = vmatpush1.bf16.msra.mxu0 %v1590_v10  ;;  %v1716_v10 = vld [vmem:[#allocation7 + $0xb4] ss:$8 sps:$4 sm:$0xff]  }
  0x96   :  { %800 = vmatprep.subr.bf16.mxu0 %v1598_v11  ;;  %v1873_v11 = vmov 0  }
  0x97   :  { %1093 = vmatpush1.bf16.msra.mxu1 %v1684_v35 }
  0x98   :  { %1094 = vmatprep.subr.bf16.mxu1 %v1689_v36 }
  0x99   :  { %801 = vmatpush1.bf16.msra.mxu0 %v1596_v14  ;;  %v89_v14 = vld [vmem:[#allocation2 + $0x30] sm:$0xff] }
  0x9a   :  { %802 = vmatprep.subr.bf16.mxu0 %v1604_v15  ;;  %v96_v15 = vld [vmem:[#allocation2 + $0x68] sm:$0xff] }
  0x9b   :  { %1095 = vmatpush1.bf16.msra.mxu1 %v1687_v39  ;;  %v103_v17 = vpack.c.bf16 %v96_v15, %v89_v14 }
  0x9c   :  { %1096 = vmatprep.subr.bf16.mxu1 %v1692_v40 }
  0x9d   :  { %803 = vmatpush1.bf16.msra.mxu0 %v1602_v18  ;;  %v1720_v18 = vld [vmem:[#allocation7 + $0xd0] ss:$8 sps:$4 sm:$0xff]  }
  0x9e   :  { %804 = vmatprep.subr.bf16.mxu0 %v1610_v19  ;;  %v1722_v19 = vld [vmem:[#allocation7 + $0xd4] ss:$8 sps:$4 sm:$0xff]  }
  0x9f   :  { %1097 = vmatpush1.bf16.msra.mxu1 %v1690_v43 }
  0xa0   :  { %1098 = vmatprep.subr.bf16.mxu1 %v1695_v44 }
  0xa1   :  { %805 = vmatpush1.bf16.msra.mxu0 %v1608_v22  ;;  %v1728_v22 = vld [vmem:[#allocation7 + $0xf4] ss:$8 sps:$4 sm:$0xff]  }
  0xa2   :  { %806 = vmatprep.subr.bf16.mxu0 %v1616_v23  ;;  %v1726_v23 = vld [vmem:[#allocation7 + $0xf0] ss:$8 sps:$4 sm:$0xff]  }
  0xa3   :  { %1099 = vmatpush1.bf16.msra.mxu1 %v1693_v47 }
  0xa4   :  { %1100 = vmatprep.subr.bf16.mxu1 %v1698_v48 }
  0xa5   :  { %807 = vmatpush1.bf16.msra.mxu0 %v1614_v25 }
  0xa6   :  { %808 = vmatprep.subr.bf16.mxu0 %v1622_v29  ;;  %v204_v29 = vlaneseq }
  0xa7   :  { %1101 = vmatpush1.bf16.msra.mxu1 %v1696_v51 }
  0xa8   :  { %1102 = vmatprep.subr.bf16.mxu1 %v1701_v52  ;;  %v205_v30 = vshrl.u32 %v204_v29, 7 }
  0xa9   :  { %809 = vmatpush1.bf16.msra.mxu0 %v1620_v33 }
  0xaa   :  { %810 = vmatprep.subr.bf16.mxu0 %v1628_v34  ;;  %v206_v31 = vsub.s32 0, %v205_v30  ;;  %v210_v33 = vsub.s32 1, %v205_v30 }
  0xab   :  { %1103 = vmatpush1.bf16.msra.mxu1 %v1699_v55  ;;  %v1731_v55 = vld [vmem:[#allocation8 + $0x48] sm:$0xff]  }
  0xac   :  { %1104 = vmatprep.subr.bf16.mxu1 %v1704_v56  ;;  %v207_v34 = vrot.slane %v202_v32, %v206_v31  ;;  %v211_v35 = vrot.slane %v202_v32, %v210_v33  ;;  %v1732_v56 = vld [vmem:[#allocation8 + $0x8] sm:$0xff]  }
  0xad   :  { %811 = vmatpush1.bf16.msra.mxu0 %v1626_v37 }
  0xae   :  { %812 = vmatprep.subr.bf16.mxu0 %v1634_v38 }
  0xaf   :  { %1105 = vmatpush1.bf16.msra.mxu1 %v1702_v59  ;;  %v1735_v59 = vld [vmem:[#allocation8 + $0x58] sm:$0xff]  }
  0xb0   :  { %1106 = vmatprep.subr.bf16.mxu1 %v1707_v60  ;;  %v1736_v60 = vld [vmem:[#allocation8 + $0x18] sm:$0xff]  }
  0xb1   :  { %813 = vmatpush1.bf16.msra.mxu0 %v1632_v41 }
  0xb2   :  { %814 = vmatprep.subr.bf16.mxu0 %v1640_v42 }
  0xb3   :  { %1107 = vmatpush1.bf16.msra.mxu1 %v1705_v63  ;;  %v1739_v63 = vld [vmem:[#allocation8 + $0x68] sm:$0xff]  }
  0xb4   :  { %1108 = vmatprep.subr.bf16.mxu1 %v1710_v0  ;;  %v1740_v0 = vld [vmem:[#allocation8 + $0x28] sm:$0xff]  }
  0xb5   :  { %815 = vmatpush1.bf16.msra.mxu0 %v1638_v45 }
  0xb6   :  { %816 = vmatprep.subr.bf16.mxu0 %v1646_v46 }
  0xb7   :  { %1109 = vmatpush1.bf16.msra.mxu1 %v1708_v5  ;;  %v918_v5 = vld [vmem:[%s2004_s4] sm:$0x3] }
  0xb8   :  { %1110 = vmatprep.subr.bf16.mxu1 %v1713_v7  ;;  %v927_v7 = vrot.slane %v918_v5, %v210_v33 }
  0xb9   :  { %817 = vmatpush1.bf16.msra.mxu0 %v1644_v49 }
  0xba   :  { %818 = vmatprep.subr.bf16.mxu0 %v1652_v50 }
  0xbb   :  { %1111 = vmatpush1.bf16.msra.mxu1 %v1711_v9 }
  0xbc   :  { %1112 = vmatprep.subr.bf16.mxu1 %v1716_v10 }
  0xbd   :  { %819 = vmatpush1.bf16.msra.mxu0 %v1650_v53 }
  0xbe   :  { %820 = vmatprep.subr.bf16.mxu0 %v1658_v54  ;;  %v1730_v54 = vld [vmem:[#allocation8] sm:$0xff]  }
  0xbf   :  { %1113 = vmatpush1.bf16.msra.mxu1 %v1714_v12 }
  0xc0   :  { %1114 = vmatprep.subr.bf16.mxu1 %v1719_v13 }
  0xc1   :  { %821 = vmatpush1.bf16.msra.mxu0 %v1656_v57  ;;  %v1733_v57 = vld [vmem:[#allocation8 + $0x50] sm:$0xff]  }
  0xc2   :  { %822 = vmatprep.subr.bf16.mxu0 %v1664_v58  ;;  %v1734_v58 = vld [vmem:[#allocation8 + $0x10] sm:$0xff]  }
  0xc3   :  { %1115 = vmatpush1.bf16.msra.mxu1 %v1717_v16 }
  0xc4   :  { %1116 = vmatprep.subr.bf16.mxu1 %v1722_v19 }
  0xc5   :  { %823 = vmatpush1.bf16.msra.mxu0 %v1662_v61  ;;  %v1737_v61 = vld [vmem:[#allocation8 + $0x60] sm:$0xff]  }
  0xc6   :  { %824 = vmatprep.subr.bf16.mxu0 %v1670_v62  ;;  %v1738_v62 = vld [vmem:[#allocation8 + $0x20] sm:$0xff]  }
  0xc7   :  { %1117 = vmatpush1.bf16.msra.mxu1 %v1720_v18 }
  0xc8   :  { %1118 = vmatprep.subr.bf16.mxu1 %v1725_v20 }
  0xc9   :  { %825 = vmatpush1.bf16.msra.mxu0 %v1668_v1  ;;  %v1741_v1 = vld [vmem:[#allocation8 + $0x70] sm:$0xff]  }
  0xca   :  { %837 = vmatprep.subr.bf16.mxu0 %v1676_v4  ;;  %v1744_v4 = vld [vmem:[#allocation8 + $0x38] sm:$0xff]  }
  0xcb   :  { %1119 = vmatpush1.bf16.msra.mxu1 %v1723_v21 }
  0xcc   :  { %827 = vmatmul.mubr.bf16.vlgmr.msra.gmra.mrb[0].mxu0 %v101_v6  ;;  %1120 = vmatprep.subr.bf16.mxu1 %v1728_v22  ;;  %v923_v6 = vrot.slane %v918_v5, %v206_v31 }
  0xcd   :  { %838 = vmatpush1.bf16.msra.mxu0 %v1674_v8  ;;  %869 = vmatprep.mubr.bf16.mxu0 %v1873_v11 }
  0xcf   :  { %1121 = vmatpush1.bf16.msra.mxu1 %v1726_v23  ;;  %v1467_v23 = vld [vmem:[%s2006_s6] ss:$0 sm:$0xff] }
  0xd0   :  { %1484 = vmatprep.subr.bf16.mxu1 %v1729_v24 }
  0xd8   :  { %1434 = vmatmul.mubr.msk.bf16.vlgmr.msra.gmra.mrb[0].mxu0 %vm704_vm0, %v103_v17 }
 0x165   :  { %v742_v25 = vpop.f32.mrb[0].mxu1 }
 0x166   :  { %v744_v26 = vpop.f32.mrb[1].mxu1  ;;  %v743_v36 = vadd.f32 %v742_v25, %v207_v34 }
 0x167   :  { %v746_v27 = vpop.f32.mrb[2].mxu1  ;;  %v745_v37 = vadd.f32 %v744_v26, %v211_v35 }
 0x168   :  { %v748_v28 = vpop.f32.mrb[3].mxu1  ;;  %v747_v39 = vadd.f32 %v746_v27, %v207_v34 }
 0x169   :  { %v749_v42 = vadd.f32 %v748_v28, %v211_v35 }
 0x1ab   :  { %v871_v38 = vpop.f32.mrb[0].mxu0 }
 0x1ac   :  { %v1507_v40 = vadd.f32 %v871_v38, %v743_v36  ;;  %v873_v41 = vpop.f32.mrb[1].mxu0 }
 0x1ad   :  { %v1509_v43 = vadd.f32 %v873_v41, %v745_v37  ;;  %v875_v44 = vpop.f32.mrb[2].mxu0 }
 0x1ae   :  { %v1511_v45 = vadd.f32 %v875_v44, %v747_v39  ;;  %v877_v46 = vpop.f32.mrb[3].mxu0  ;;  %v880_v48 = vmax.f32 %v1507_v40, 0.0 }
 0x1af   :  { %v1513_v47 = vadd.f32 %v877_v46, %v749_v42  ;;  %v881_v50 = vmax.f32 %v1509_v43, 0.0 }
 0x1b0   :  { %v882_v49 = vmax.f32 %v1511_v45, 0.0 }
 0x1b1   :  { %v883_v51 = vmax.f32 %v1513_v47, 0.0 }
 0x1b2   :  { %v884_v52 = vpack.c.bf16 %v882_v49, %v880_v48 }
 0x1b3   :  { %v885_v53 = vpack.c.bf16 %v883_v51, %v881_v50 }
 0x1b5   :  { %1122 = vmatprep.mubr.bf16.mxu1 %v885_v53 }
 0x1b6   :  { %1123 = vmatmul.mubr.bf16.vlgmr.msra.gmra.mrb[4].mxu1 %v884_v52 }
 0x1b7   :  { %1485 = vmatpush3.bf16.msra.mxu1 %v1730_v54 }
 0x1b8   :  { %1486 = vmatprep.subr.bf16.mxu1 %v1731_v55 }
 0x1bb   :  { %1487 = vmatpush3.bf16.msra.mxu1 %v1732_v56 }
 0x1bc   :  { %1488 = vmatprep.subr.bf16.mxu1 %v1733_v57 }
 0x1bf   :  { %1489 = vmatpush3.bf16.msra.mxu1 %v1734_v58 }
 0x1c0   :  { %1490 = vmatprep.subr.bf16.mxu1 %v1735_v59 }
 0x1c3   :  { %1491 = vmatpush3.bf16.msra.mxu1 %v1736_v60 }
 0x1c4   :  { %1492 = vmatprep.subr.bf16.mxu1 %v1737_v61 }
 0x1c7   :  { %1493 = vmatpush3.bf16.msra.mxu1 %v1738_v62 }
 0x1c8   :  { %1494 = vmatprep.subr.bf16.mxu1 %v1739_v63 }
 0x1cb   :  { %1495 = vmatpush3.bf16.msra.mxu1 %v1740_v0 }
 0x1cc   :  { %1496 = vmatprep.subr.bf16.mxu1 %v1741_v1 }
 0x1cf   :  { %1497 = vmatpush3.bf16.msra.mxu1 %v1742_v2 }
 0x1d0   :  { %1498 = vmatprep.subr.bf16.mxu1 %v1743_v3 }
 0x1d3   :  { %1499 = vmatpush3.bf16.msra.mxu1 %v1744_v4 }
 0x289   :  { %v1124_v8 = vpop.f32.mrb[4].mxu1 }
 0x28a   :  { %v1125_v9 = vadd.f32 %v1124_v8, %v923_v6  ;;  %v1126_v10 = vpop.f32.mrb[5].mxu1 }
 0x28b   :  { %v1127_v11 = vadd.f32 %v1126_v10, %v927_v7  ;;  %v1128_v12 = vpop.f32.mrb[6].mxu1 }
 0x28c   :  { %v1129_v13 = vadd.f32 %v1128_v12, %v923_v6  ;;  %v1130_v14 = vpop.f32.mrb[7].mxu1  ;;  %v1133_v16 = vmax.f32 %v1125_v9, 0.0 }
 0x28d   :  { %v1131_v15 = vadd.f32 %v1130_v14, %v927_v7  ;;  %v1134_v18 = vmax.f32 %v1127_v11, 0.0 }
 0x28e   :  { %v1135_v17 = vmax.f32 %v1129_v13, 0.0 }
 0x28f   :  { %v1136_v19 = vmax.f32 %v1131_v15, 0.0 }
 0x290   :  { %v1137_v20 = vpack.c.bf16 %v1135_v17, %v1133_v16 }
 0x291   :  { %v1138_v21 = vpack.c.bf16 %v1136_v19, %v1134_v18 }
 0x293   :  { %1306 = vmatprep.mubr.bf16.mxu1 %v1138_v21 }
 0x294   :  { %1307 = vmatmul.mubr.bf16.vlgmr.msra.gmra.mrb[8].mxu1 %v1137_v20 }
 0x367   :  { %v1500_v22 = vpop.f32.mrb[8].mxu1 }
 0x368   :  { %v1501_v24 = vpop.f32.mrb[9].mxu1 }
 0x369   :  { %v1502_v25 = vadd.f32 %v1501_v24, %v1500_v22  ;;  %v1503_v26 = vpop.f32.mrb[10].mxu1 }
 0x36a   :  { %v1504_v27 = vpop.f32.mrb[11].mxu1 }
 0x36b   :  { %v1309_v28 = vadd.f32 %v1502_v25, %v1467_v23  ;;  %v1505_v29 = vadd.f32 %v1504_v27, %v1503_v26 }
 0x36d   :  { %1315 = vst [vmem:[#allocation10] sm:$0xff] %v1309_v28  ;;  %v1312_v30 = vadd.f32 %v1505_v29, %v1467_v23 }
 0x36f   :  { %1316 = vst [vmem:[#allocation10 + $0x8] sm:$0xff] %v1312_v30 }
 0x370   :  { %1844 = shalt.err (!%p1841_p8)
}
 0x371   :  { %s1845_s17 = scalar_lea.hbm %s2007_s7, 256 }
 0x372   :  { %p1846_p9 = scmp.ne.s32.totalorder %s2007_s7, %s1845_s17  ;;  %p1849_p10 = scmp.lt.u32.totalorder %s1845_s17, %s2007_s7 }
 0x374   :  { %p1851_p11 = pnand %p1849_p10, %p1846_p9 }
 0x376   :  { %1854 = shalt.err (!%p1851_p11)
}
 0x377   :  { %1328 = dma.vmem_to_hbm [thread:$0]  %s1323_s13, 256, %s2007_s7, [#allocation4], %s1864_s11, %s1864_s11, %s1865_s12  }
 0x378   :  { %1861 = dma.done.wait [#allocation4], 256  }
 0x379   :  { %1862 = vsyncadd [#allocation4], 4294967040 }
 0x37a   :  { %1332 = vsyncpa [#allocation3], 1 }
 0x37b   :  { %1333 = vsyncpa [#allocation6], 1 }
 0x37c   :  { %1334 = vsyncpa [#allocation9], 1 }
 0x37d   :  { %1335 = vsyncpa [#allocation4], 1 }

</bundles_post_ra>
